<compile_context>
chip_gen: v7x
topology: tpu7x:2x2x1
jax: 0.10.0
libtpu: 0.0.40
codegen_flags: <defaults>
</compile_context>

<pallas_src>
import numpy as np

import jax
import jax.numpy as jnp
from jax.experimental import pallas as pl
from jax.experimental.pallas import tpu as pltpu

# 7x7 edge filter from the PyTorch module (divided by 20.8451 in forward()).
_EDGE_FILTER = [
    [-0.2357, -0.2774, -0.3162, -0.3333, -0.3162, -0.2774, -0.2357],
    [-0.2774, -0.3536, -0.4472, -0.5000, -0.4472, -0.3536, -0.2774],
    [-0.3162, -0.4472, -0.7071, -1.0000, -0.7071, -0.4472, -0.3162],
    [-0.3333, -0.5000, -1.0000, 20.8451, -1.0000, -0.5000, -0.3333],
    [-0.3162, -0.4472, -0.7071, -1.0000, -0.7071, -0.4472, -0.3162],
    [-0.2774, -0.3536, -0.4472, -0.5000, -0.4472, -0.3536, -0.2774],
    [-0.2357, -0.2774, -0.3162, -0.3333, -0.3162, -0.2774, -0.2357],
]
_FILTER_SCALE = 20.8451


def _make_stencil_matrices(Hp, W, B):
    """Constant matrices implementing the 7x7 stencil + replicate pad.

    conv(y,x) = sum_{i,j} f[i,j] * o(clamp(y+i-3, 0, Hp-1), clamp(x+j-3, 0, W-1))
              = sum_{k=0..2} (P_k @ o @ G_k)(y,x) + (o @ G_3)(y,x)

    G_k[c, x]  = sum_j f[k, j] * 1[c == clamp(x + j - 3, 0, W-1)]     (col clamp)
    P_k[y, r]  = 1[r == clamp(y+k-3)] + 1[r == clamp(y+3-k)]          (row clamp,
                 folding rows k and 6-k via the filter's vertical symmetry).

    Returned as:
      Pblk : (3, B*Hp, B*Hp)  block-diagonal (B copies) so B images can be
                              stacked along the matmul M dimension.
      Gcat : (W, 4*W)         [G0 | G1 | G2 | G3] for one fused MXU matmul.
    """
    filt = np.asarray(_EDGE_FILTER, np.float32) / np.float32(_FILTER_SCALE)

    G = np.zeros((4, W, W), np.float32)
    for k in range(4):
        for j in range(7):
            for x in range(W):
                c = min(max(x + j - 3, 0), W - 1)
                G[k, c, x] += filt[k, j]
    Gcat = np.concatenate([G[0], G[1], G[2], G[3]], axis=1)      # (W, 4W)

    P = np.zeros((3, Hp, Hp), np.float32)
    for k in range(3):
        for i in (k, 6 - k):
            for y in range(Hp):
                r = min(max(y + i - 3, 0), Hp - 1)
                P[k, y, r] += 1.0
    eye_b = np.eye(B, dtype=np.float32)
    Pblk = np.stack([np.kron(eye_b, P[k]) for k in range(3)])    # (3, B*Hp, B*Hp)

    return jnp.asarray(Pblk), jnp.asarray(Gcat)


def _edge_mce_kernel(pblk_ref, gcat_ref, orig_ref, reb_ref, out_ref):
    o = orig_ref[...]                    # (B*Hp, W) f32 — B images stacked on M
    r = reb_ref[...]

    # |origin - rebuild|^3  (elementwise, VPU)
    d = o - r
    mce = jnp.abs(d * d * d)

    w = o.shape[1]

    # Column mixing for all 4 distinct filter rows in ONE fused MXU matmul.
    og = jnp.dot(o, gcat_ref[...], preferred_element_type=jnp.float32)  # (B*Hp, 4W)

    # Row mixing + replicate row-clamp via block-diagonal P matrices
    # (rows k and 6-k of the filter share coefficients -> 3 matmuls + 1 add).
    conv = og[:, 3 * w:4 * w]
    for k in range(3):
        conv = conv + jnp.dot(pblk_ref[k], og[:, k * w:(k + 1) * w],
                              preferred_element_type=jnp.float32)

    weight = jnp.abs(conv) * jnp.float32(1.0 / 255.0)

    # Two-stage reduction (row sums, then total) -> better f32 accumulation on
    # large tiles. One partial per grid step; the batch axis stays 'parallel'.
    row_sums = jnp.sum(mce * weight, axis=1, keepdims=True)      # (B*Hp, 1)
    out_ref[...] = jnp.sum(row_sums).reshape(1, 1, 1)


def edge_mce(origin, rebuild):
    """origin, rebuild: (N, 1, H, W) float -> scalar float32 (== torch forward)."""
    N, C, H, W = origin.shape
    assert C == 1, "edgeFilter has in_channels=1, so C must be 1"

    orig = origin[:, 0, :, :].astype(jnp.float32)      # (N, H, W)
    reb = rebuild[:, 0, :, :].astype(jnp.float32)      # (N, H, W)

    # --- Pad H up to a multiple of 8 with ORIGIN's edge row (for both arrays).
    # Replicated origin rows keep the replicate-pad conv exact for real rows,
    # and origin==rebuild on pad rows => mce=0 => zero contribution to the sum.
    Hp = ((H + 7) // 8) * 8
    if Hp != H:
        edge = orig[:, H - 1:H, :]                                     # (N,1,W)
        pad = jnp.broadcast_to(edge, (N, Hp - H, W))
        orig = jnp.concatenate([orig, pad], axis=1)
        reb = jnp.concatenate([reb, pad], axis=1)

    # --- Pick images-per-step B so B*Hp approaches the MXU tile (<= 256 rows).
    B = min(N, max(1, 256 // Hp))
    n_steps = -(-N // B)                                 # cdiv
    Npad = n_steps * B
    if Npad != N:
        z = jnp.zeros((Npad - N, Hp, W), jnp.float32)    # zero images: contribute 0
        orig = jnp.concatenate([orig, z], axis=0)
        reb = jnp.concatenate([reb, z], axis=0)

    # Flatten batch groups into the matmul M dimension (free leading-dim merge).
    orig2d = orig.reshape(Npad * Hp, W)
    reb2d = reb.reshape(Npad * Hp, W)

    Pblk, Gcat = _make_stencil_matrices(Hp, W, B)        # (3,BHp,BHp), (W,4W)
    bhp = B * Hp

    # Explicit VMEM budget (stays at the 32 MiB default for small images).
    est_bytes = 4 * (
        2 * 2 * bhp * W            # origin/rebuild tiles, double-buffered
        + 2 * 3 * bhp * bhp        # Pblk (resident constant, 2 bufs by default)
        + 2 * 4 * W * W            # Gcat
        + 10 * bhp * 4 * W         # intermediates (og, conv, mce, weight, ...)
    )
    vmem_limit = int(min(112 * 1024 * 1024, max(32 * 1024 * 1024, 2 * est_bytes)))

    partials = pl.pallas_call(
        _edge_mce_kernel,
        out_shape=jax.ShapeDtypeStruct((n_steps, 1, 1), jnp.float32),
        grid_spec=pltpu.PrefetchScalarGridSpec(
            num_scalar_prefetch=0,
            grid=(n_steps,),
            in_specs=[
                # Constant stencil matrices: constant index_map -> resident in
                # VMEM across grid steps (no per-step re-DMA).
                pl.BlockSpec((3, bhp, bhp), lambda g: (0, 0, 0)),
                pl.BlockSpec((W, 4 * W), lambda g: (0, 0)),
                # Image streams: each pixel read from HBM exactly once.
                pl.BlockSpec((bhp, W), lambda g: (g, 0)),
                pl.BlockSpec((bhp, W), lambda g: (g, 0)),
            ],
            out_specs=pl.BlockSpec((1, 1, 1), lambda g: (g, 0, 0)),
        ),
        compiler_params=pltpu.CompilerParams(
            dimension_semantics=("parallel",),
            vmem_limit_bytes=vmem_limit),
    )(Pblk, Gcat, orig2d, reb2d)

    total = N * C * H * W                                # original element count
    return jnp.sum(partials) / jnp.float32(total)


def edge_mce_reference(origin, rebuild):
    """Pure-JAX reference for verification (faithful to the PyTorch forward)."""
    filt = jnp.asarray(_EDGE_FILTER, jnp.float32) / _FILTER_SCALE
    orig = origin.astype(jnp.float32)
    reb = rebuild.astype(jnp.float32)
    mce = jnp.abs((orig - reb) ** 3)
    padded = jnp.pad(orig, ((0, 0), (0, 0), (3, 3), (3, 3)), mode="edge")
    conv = jax.lax.conv_general_dilated(
        padded, filt[None, None, :, :],
        window_strides=(1, 1), padding="VALID",
        dimension_numbers=("NCHW", "OIHW", "NCHW"),
        precision=jax.lax.Precision.HIGHEST)
    weight = jnp.abs(conv) / 255.0
    return jnp.mean(mce * weight)


if __name__ == "__main__":
    key = jax.random.PRNGKey(0)
    k1, k2 = jax.random.split(key)
    N, C, H, W = 2, 1, 16, 16
    # Image-like values in [0, 255) plus a perturbed "rebuild".
    origin = jax.random.uniform(k1, (N, C, H, W), jnp.float32) * 255.0
    rebuild = origin + jax.random.normal(k2, (N, C, H, W), jnp.float32) * 5.0

    result = jax.block_until_ready(edge_mce(origin, rebuild))
    ref = edge_mce_reference(origin, rebuild)

    # Tolerance leaves margin for MXU f32 matmul rounding while still catching
    # any real stencil/padding construction bug (those show up at the % level).
    assert jnp.allclose(result, ref, rtol=2e-3, atol=2e-3), (result, ref)
    print("KERNEL_OK")
</pallas_src>

<mosaic_0001>
module attributes {stable_mosaic.version = 11 : i64} {
  func.func @_edge_mce_kernel(%arg0: i32, %arg1: memref<3x32x32xf32, #tpu.memory_space<vmem>>, %arg2: memref<16x64xf32, #tpu.memory_space<vmem>>, %arg3: memref<32x16xf32, #tpu.memory_space<vmem>>, %arg4: memref<32x16xf32, #tpu.memory_space<vmem>>, %arg5: memref<1x1x1xf32, #tpu.memory_space<vmem>>) attributes {dimension_semantics = [#tpu.dimension_semantics<parallel>], iteration_bounds = array<i64: 1>, scalar_prefetch = 0 : i64, scratch_operands = 0 : i64, tpu.core_type = #tpu.core_type<tc>, window_params = [{pipeline_mode = #tpu.pipeline_mode<synchronous>, transform_indices = @transform_0, window_bounds = array<i64: 3, 32, 32>}, {pipeline_mode = #tpu.pipeline_mode<synchronous>, transform_indices = @transform_1, window_bounds = array<i64: 16, 64>}, {transform_indices = @transform_2, window_bounds = array<i64: 32, 16>}, {transform_indices = @transform_3, window_bounds = array<i64: 32, 16>}, {transform_indices = @transform_4, window_bounds = array<i64: 1, 1, 1>}]} {
    %c0 = arith.constant 0 : index
    %c0_0 = arith.constant 0 : index
    %0 = vector.load %arg3[%c0, %c0_0] : memref<32x16xf32, #tpu.memory_space<vmem>>, vector<32x16xf32>
    %c0_1 = arith.constant 0 : index
    %c0_2 = arith.constant 0 : index
    %1 = vector.load %arg4[%c0_1, %c0_2] : memref<32x16xf32, #tpu.memory_space<vmem>>, vector<32x16xf32>
    %2 = arith.subf %0, %1 : vector<32x16xf32>
    %3 = arith.mulf %2, %2 : vector<32x16xf32>
    %4 = arith.mulf %3, %2 : vector<32x16xf32>
    %5 = math.absf %4 : vector<32x16xf32>
    %c0_3 = arith.constant 0 : index
    %c0_4 = arith.constant 0 : index
    %6 = vector.load %arg2[%c0_3, %c0_4] : memref<16x64xf32, #tpu.memory_space<vmem>>, vector<16x64xf32>
    %cst = arith.constant dense<0.000000e+00> : vector<32x64xf32>
    %7 = tpu.matmul %0, %6, %cst {dimension_numbers = #tpu.dot_dimension_numbers<[1], [0], [0], [1], [0, 0, 1, 1], [], []>} : vector<32x16xf32>, vector<16x64xf32>, vector<32x64xf32> -> vector<32x64xf32>
    %8 = vector.extract_strided_slice %7 {offsets = [0, 48], sizes = [32, 16], strides = [1, 1]} : vector<32x64xf32> to vector<32x16xf32>
    %c0_5 = arith.constant 0 : index
    %c0_6 = arith.constant 0 : index
    %c0_7 = arith.constant 0 : index
    %9 = vector.load %arg1[%c0_5, %c0_6, %c0_7] : memref<3x32x32xf32, #tpu.memory_space<vmem>>, vector<1x32x32xf32>
    %10 = vector.shape_cast %9 : vector<1x32x32xf32> to vector<32x32xf32>
    %11 = vector.extract_strided_slice %7 {offsets = [0, 0], sizes = [32, 16], strides = [1, 1]} : vector<32x64xf32> to vector<32x16xf32>
    %cst_8 = arith.constant dense<0.000000e+00> : vector<32x16xf32>
    %12 = tpu.matmul %10, %11, %cst_8 {dimension_numbers = #tpu.dot_dimension_numbers<[1], [0], [0], [1], [0, 0, 1, 1], [], []>} : vector<32x32xf32>, vector<32x16xf32>, vector<32x16xf32> -> vector<32x16xf32>
    %13 = arith.addf %8, %12 : vector<32x16xf32>
    %c1 = arith.constant 1 : index
    %c0_9 = arith.constant 0 : index
    %c0_10 = arith.constant 0 : index
    %14 = vector.load %arg1[%c1, %c0_9, %c0_10] : memref<3x32x32xf32, #tpu.memory_space<vmem>>, vector<1x32x32xf32>
    %15 = vector.shape_cast %14 : vector<1x32x32xf32> to vector<32x32xf32>
    %16 = vector.extract_strided_slice %7 {offsets = [0, 16], sizes = [32, 16], strides = [1, 1]} : vector<32x64xf32> to vector<32x16xf32>
    %cst_11 = arith.constant dense<0.000000e+00> : vector<32x16xf32>
    %17 = tpu.matmul %15, %16, %cst_11 {dimension_numbers = #tpu.dot_dimension_numbers<[1], [0], [0], [1], [0, 0, 1, 1], [], []>} : vector<32x32xf32>, vector<32x16xf32>, vector<32x16xf32> -> vector<32x16xf32>
    %18 = arith.addf %13, %17 : vector<32x16xf32>
    %c2 = arith.constant 2 : index
    %c0_12 = arith.constant 0 : index
    %c0_13 = arith.constant 0 : index
    %19 = vector.load %arg1[%c2, %c0_12, %c0_13] : memref<3x32x32xf32, #tpu.memory_space<vmem>>, vector<1x32x32xf32>
    %20 = vector.shape_cast %19 : vector<1x32x32xf32> to vector<32x32xf32>
    %21 = vector.extract_strided_slice %7 {offsets = [0, 32], sizes = [32, 16], strides = [1, 1]} : vector<32x64xf32> to vector<32x16xf32>
    %cst_14 = arith.constant dense<0.000000e+00> : vector<32x16xf32>
    %22 = tpu.matmul %20, %21, %cst_14 {dimension_numbers = #tpu.dot_dimension_numbers<[1], [0], [0], [1], [0, 0, 1, 1], [], []>} : vector<32x32xf32>, vector<32x16xf32>, vector<32x16xf32> -> vector<32x16xf32>
    %23 = arith.addf %18, %22 : vector<32x16xf32>
    %24 = math.absf %23 : vector<32x16xf32>
    %cst_15 = arith.constant 0.00392156886 : f32
    %25 = vector.broadcast %cst_15 : f32 to vector<32x16xf32>
    %26 = arith.mulf %24, %25 : vector<32x16xf32>
    %27 = arith.mulf %5, %26 : vector<32x16xf32>
    %cst_16 = arith.constant dense<0.000000e+00> : vector<32xf32>
    %28 = vector.multi_reduction <add>, %27, %cst_16 [1] : vector<32x16xf32> to vector<32xf32>
    %29 = vector.shape_cast %28 : vector<32xf32> to vector<32x1xf32>
    %30 = vector.shape_cast %29 : vector<32x1xf32> to vector<1x32x1xf32>
    %cst_17 = arith.constant dense<0.000000e+00> : vector<1xf32>
    %31 = vector.multi_reduction <add>, %30, %cst_17 [1, 2] : vector<1x32x1xf32> to vector<1xf32>
    %32 = vector.shape_cast %31 : vector<1xf32> to vector<1x1x1xf32>
    %33 = vector.extract %32[0, 0, 0] : f32 from vector<1x1x1xf32>
    %34 = vector.broadcast %33 : f32 to vector<1x1x1xf32>
    %c0_18 = arith.constant 0 : index
    %c0_19 = arith.constant 0 : index
    %c0_20 = arith.constant 0 : index
    %35 = vector.load %arg5[%c0_18, %c0_19, %c0_20] : memref<1x1x1xf32, #tpu.memory_space<vmem>>, vector<1x1x1xf32>
    tpu.vector_store %arg5[%c0_18, %c0_19, %c0_20], %34 {strides = array<i32>} : memref<1x1x1xf32, #tpu.memory_space<vmem>>, vector<1x1x1xf32>,
    return
  }
  func.func @transform_0(%arg0: i32) -> (i32, i32, i32) {
    %c0_i32 = arith.constant 0 : i32
    %c0_i32_0 = arith.constant 0 : i32
    %c0_i32_1 = arith.constant 0 : i32
    %c0_i32_2 = arith.constant 0 : i32
    return %c0_i32, %c0_i32_0, %c0_i32_1 : i32, i32, i32
  }
  func.func @transform_1(%arg0: i32) -> (i32, i32) {
    %c0_i32 = arith.constant 0 : i32
    %c0_i32_0 = arith.constant 0 : i32
    %c0_i32_1 = arith.constant 0 : i32
    return %c0_i32, %c0_i32_0 : i32, i32
  }
  func.func @transform_2(%arg0: i32) -> (i32, i32) {
    %c0_i32 = arith.constant 0 : i32
    %c0_i32_0 = arith.constant 0 : i32
    return %arg0, %c0_i32 : i32, i32
  }
  func.func @transform_3(%arg0: i32) -> (i32, i32) {
    %c0_i32 = arith.constant 0 : i32
    %c0_i32_0 = arith.constant 0 : i32
    return %arg0, %c0_i32 : i32, i32
  }
  func.func @transform_4(%arg0: i32) -> (i32, i32, i32) {
    %c0_i32 = arith.constant 0 : i32
    %c0_i32_0 = arith.constant 0 : i32
    %c0_i32_1 = arith.constant 0 : i32
    return %arg0, %c0_i32, %c0_i32_0 : i32, i32, i32
  }
}

</mosaic_0001>

<bundles_post_ra>
// kernel: tpu_custom_call.1
= control target key start
LH: loop header
LB: loop body
LE: loop exit
PB: predicated region body
PF: predicated region fallthrough
CT: control target
= control target key end

     0   :  { %9 = vsyncpa [#allocation3], 0  ;;  %s972_s0 = inlined_call_operand.hbm [shape: f32[3,32,32], index: 0, kind: input, shape index: {}]   ;;  %s973_s1 = inlined_call_operand.vmem [shape: f32[16,64], index: 1, kind: input, shape index: {}]   ;;  %s974_s2 = inlined_call_operand.vmem [shape: f32[32,16], index: 2, kind: input, shape index: {}]   ;;  %s975_s3 = inlined_call_operand.vmem [shape: f32[32,16], index: 3, kind: input, shape index: {}]   ;;  %s976_s4 = inlined_call_operand.hbm [shape: f32[1,1,1], index: 4, kind: output, shape index: {}]  }
   0x1   :  { %10 = vsyncpa [#allocation4], 0  ;;  %s829_s15 = smov [#allocation2]   ;;  %s781_s19 = scalar_lea.hbm %s972_s0, 1536 }
   0x2   :  { %s16_s16 = sshll.u32 %s829_s15, 4  ;;  %p782_p0 = scmp.ne.s32.totalorder %s972_s0, %s781_s19  ;;  %s17_s16 = int_to_ptr.vmem [resolvable:$true] %s16_s16 }
   0x3   :  { %p785_p1 = scmp.lt.u32.totalorder %s781_s19, %s972_s0 }
   0x5   :  { %p787_p2 = pnand %p785_p1, %p782_p0 }
   0x7   :  { %790 = shalt.err (!%p787_p2)
}
   0x8   :  { %s791_s24 = scalar_lea.vmem %s17_s16, 1536  ;;  %p796_p4 = scmp.lt.s32.totalorder %s17_s16, %s17_s16 }
   0x9   :  { %p792_p3 = scmp.ne.s32.totalorder %s17_s16, %s791_s24  ;;  %p797_p5 = scmp.lt.s32.totalorder %s791_s24, %s791_s24 }
   0xb   :  { %p798_p6 = por %p797_p5, %p796_p4 }
   0xd   :  { %p799_p7 = pnand %p798_p6, %p792_p3 }
   0xf   :  { %802 = shalt.err (!%p799_p7)
}
  0x10   :  { %s830_s25 = smov 128   ;;  %s831_s26 = smov 8  }
  0x11   :  { %22 = dma.hbm_to_vmem [thread:$0]  %s972_s0, 1536, %s17_s16, [#allocation3], %s830_s25, %s830_s25, %s831_s26  }
  0x12   :  { %825 = dma.done.wait [#allocation3], 1536  }
  0x13   :  { %826 = vsyncadd [#allocation3], 4294965760  ;;  %vm58_vm0 = vcmask 130048   ;;  %v56_v0 = vld [vmem:[%s973_s1] sm:$0xff]  ;;  %v57_v1 = vld [vmem:[%s973_s1 + $0x8] sm:$0xff]  ;;  %vm160_vm1 = vcmask 261120  }
  0x14   :  { %v883_v2 = vld [vmem:[%s974_s2] sm:$0xff]  ;;  %v723_v3 = vpack.c.bf16 %v57_v1, %v56_v0  ;;  %v890_v4 = vld [vmem:[%s974_s2 + $0x8] sm:$0xff]  ;;  %v895_v5 = vld [vmem:[%s974_s2 + $0x10] sm:$0xff]  ;;  %s833_s13 = smov 96   ;;  %s834_s14 = smov 48   ;;  %vm590_vm2 = vcmask 7168  }
  0x15   :  { %675 = vmatprep.mubr.msk.f32.mxu0 %vm58_vm0, %v883_v2  ;;  %v904_v6 = vld [vmem:[%s974_s2 + $0x18] sm:$0xff]  ;;  %v156_v7 = vld [vmem:[#allocation2] sm:$0xff]  ;;  %s832_s2 = smov 112   ;;  %v157_v17 = vld [vmem:[#allocation2 + $0x8] sm:$0xff]  ;;  %s835_s15 = smov 80   ;;  %vm608_vm3 = vcmask 0  }
  0x16   :  { %724 = vmatprep.subr.bf16.mxu0 %v723_v3  ;;  %689 = vmatprep.mubr.msk.f32.mxu1 %vm160_vm1, %v156_v7  ;;  %v279_v10 = vld [vmem:[#allocation2 + $0x20] sm:$0xff]  ;;  %v158_v18 = vld [vmem:[#allocation2 + $0x10] sm:$0xff]  ;;  %v159_v19 = vld [vmem:[#allocation2 + $0x18] sm:$0xff] }
  0x17   :  { %726 = vmatpush3.bf16.msra.mxu0 %v723_v3  ;;  %v417_v20 = vld [vmem:[#allocation2 + $0x40] sm:$0xff]  ;;  %v280_v36 = vld [vmem:[#allocation2 + $0x28] sm:$0xff]  ;;  %v281_v38 = vld [vmem:[#allocation2 + $0x30] sm:$0xff] }
  0x18   :  { %v418_v39 = vld [vmem:[#allocation2 + $0x48] sm:$0xff]  ;;  %v282_v40 = vld [vmem:[#allocation2 + $0x38] sm:$0xff]  ;;  %v419_v41 = vld [vmem:[#allocation2 + $0x50] sm:$0xff] }
  0x19   :  { %v420_v42 = vld [vmem:[#allocation2 + $0x58] sm:$0xff] }
  0x1a   :  { %676 = vmatmul.mubr.msk.f32.vlgmr.msra.gmra.mrb[0].mxu0 %vm58_vm0, %v890_v4 }
  0x1b   :  { %678 = vmatprep.mubr.msk.f32.mxu0 %vm58_vm0, %v895_v5 }
  0x1e   :  { %679 = vmatmul.mubr.msk.f32.gmra.mrb[2].mxu0 %vm58_vm0, %v904_v6 }
  0x1f   :  { %703 = vmatprep.mubr.msk.f32.mxu0 %vm160_vm1, %v279_v10 }
  0xed   :  { %v909_v8 = vpop.f32.mrb[0].mxu0 }
  0xee   :  { %v911_v9 = vpop.f32.mrb[1].mxu0 }
  0xef   :  { %v761_v11 = vpack.i.bf16 %v909_v8, %v911_v9  ;;  %v727_v12 = vpack.c.bf16 %v909_v8, %v911_v9 }
  0xf1   :  { %762 = vrot.lane.b32.xlu0 %v761_v11, %s832_s2  ;;  %v918_v13 = vpop.f32.mrb[2].mxu0  ;;  %728 = vmatprep.subr.bf16.mxu1 %v727_v12 }
  0xf2   :  { %v920_v14 = vpop.f32.mrb[3].mxu0  ;;  %730 = vmatpush3.bf16.msra.mxu1 %v727_v12 }
  0xf3   :  { %v771_v15 = vpack.i.bf16 %v918_v13, %v920_v14  ;;  %v731_v16 = vpack.c.bf16 %v918_v13, %v920_v14 }
  0xf5   :  { %767 = vrot.lane.b32.xlu0 %v761_v11, %s833_s13  ;;  %772 = vrot.lane.b32.xlu1 %v771_v15, %s832_s2 }
  0xf6   :  { %732 = vmatprep.subr.bf16.mxu1 %v731_v16 }
  0xf7   :  { %734 = vmatpush3.bf16.msra.mxu1 %v731_v16 }
  0xf9   :  { %777 = vrot.lane.b32.xlu1 %v771_v15, %s833_s13 }
  0xfa   :  { %690 = vmatmul.mubr.msk.f32.vlgmr.msra.gmra.mrb[0].mxu1 %vm160_vm1, %v157_v17 }
  0xfb   :  { %692 = vmatprep.mubr.msk.f32.mxu1 %vm160_vm1, %v158_v18 }
  0xfe   :  { %693 = vmatmul.mubr.msk.f32.gmra.mrb[2].mxu1 %vm160_vm1, %v159_v19 }
  0xff   :  { %717 = vmatprep.mubr.msk.f32.mxu1 %vm160_vm1, %v417_v20 }
 0x163   :  { %v763_v21 = vpop.permute.xlu0 %762 }
 0x164   :  { %v765_v22 = vunpack.i.h.bf16 %v763_v21  ;;  %v764_v23 = vunpack.i.l.bf16 %v763_v21 }
 0x166   :  { %v735_v24 = vpack.c.bf16 %v765_v22, %v764_v23 }
 0x167   :  { %v768_v25 = vpop.permute.xlu0 %767  ;;  %v773_v26 = vpop.permute.xlu1 %772 }
 0x168   :  { %v770_v27 = vunpack.i.h.bf16 %v768_v25  ;;  %v769_v28 = vunpack.i.l.bf16 %v768_v25  ;;  %v775_v29 = vunpack.i.h.bf16 %v773_v26  ;;  %v774_v30 = vunpack.i.l.bf16 %v773_v26  ;;  %736 = vmatprep.subr.bf16.mxu0 %v735_v24 }
 0x169   :  { %738 = vmatpush3.bf16.msra.mxu0 %v735_v24 }
 0x16a   :  { %v743_v31 = vpack.c.bf16 %v770_v27, %v769_v28  ;;  %v739_v32 = vpack.c.bf16 %v775_v29, %v774_v30 }
 0x16b   :  { %v778_v33 = vpop.permute.xlu1 %777 }
 0x16c   :  { %v780_v34 = vunpack.i.h.bf16 %v778_v33  ;;  %v779_v35 = vunpack.i.l.bf16 %v778_v33  ;;  %740 = vmatprep.subr.bf16.mxu0 %v739_v32  ;;  %744 = vmatprep.subr.bf16.mxu1 %v743_v31  ;;  %v38_v33 = vld [vmem:[%s975_s3 + $0x10] sm:$0xff] }
 0x16d   :  { %742 = vmatpush3.bf16.msra.mxu0 %v739_v32  ;;  %746 = vmatpush3.bf16.msra.mxu1 %v743_v31 }
 0x16e   :  { %v747_v37 = vpack.c.bf16 %v780_v34, %v779_v35  ;;  %v39_v34 = vld [vmem:[%s975_s3 + $0x18] sm:$0xff]  ;;  %v42_v35 = vsub.f32 %v895_v5, %v38_v33 }
 0x170   :  { %704 = vmatmul.mubr.msk.f32.vlgmr.msra.gmra.mrb[4].mxu0 %vm160_vm1, %v280_v36  ;;  %748 = vmatprep.subr.bf16.mxu1 %v747_v37 }
 0x171   :  { %750 = vmatpush3.bf16.msra.mxu1 %v747_v37  ;;  %706 = vmatprep.mubr.msk.f32.mxu0 %vm160_vm1, %v281_v38  ;;  %v43_v38 = vsub.f32 %v904_v6, %v39_v34 }
 0x174   :  { %718 = vmatmul.mubr.msk.f32.vlgmr.msra.gmra.mrb[4].mxu1 %vm160_vm1, %v418_v39  ;;  %707 = vmatmul.mubr.msk.f32.gmra.mrb[6].mxu0 %vm160_vm1, %v282_v40 }
 0x175   :  { %720 = vmatprep.mubr.msk.f32.mxu1 %vm160_vm1, %v419_v41 }
 0x178   :  { %721 = vmatmul.mubr.msk.f32.gmra.mrb[6].mxu1 %vm160_vm1, %v420_v42 }
 0x1cd   :  { %v691_v43 = vpop.f32.mrb[0].mxu1 }
 0x1ce   :  { %264 = vrot.lane.b32.xlu1 %v691_v43, %s834_s14  ;;  %v239_v44 = vpop.f32.mrb[1].mxu1 }
 0x1cf   :  { %262 = vrot.lane.b32.xlu0 %v239_v44, %s834_s14 }
 0x1d1   :  { %v694_v45 = vpop.f32.mrb[2].mxu1 }
 0x1d2   :  { %268 = vrot.lane.b32.xlu1 %v694_v45, %s834_s14  ;;  %v249_v46 = vpop.f32.mrb[3].mxu1 }
 0x1d3   :  { %266 = vrot.lane.b32.xlu0 %v249_v46, %s834_s14 }
 0x240   :  { %v265_v56 = vpop.permute.xlu1 %264 }
 0x241   :  { %v263_v55 = vpop.permute.xlu0 %262  ;;  %v275_v60 = vadd.f32 %v909_v8, %v265_v56 }
 0x242   :  { %v274_v62 = vadd.f32 %v263_v55, %v911_v9 }
 0x243   :  { %v705_v47 = vpop.f32.mrb[4].mxu0 }
 0x244   :  { %v377_v48 = vpop.f32.mrb[5].mxu0  ;;  %402 = vrot.lane.b32.xlu0 %v705_v47, %s834_s14  ;;  %v269_v58 = vpop.permute.xlu1 %268 }
 0x245   :  { %400 = vrot.lane.b32.xlu1 %v377_v48, %s834_s14  ;;  %v267_v57 = vpop.permute.xlu0 %266  ;;  %v277_v19 = vadd.f32 %v918_v13, %v269_v58  ;;  %v37_v13 = vld [vmem:[%s975_s3 + $0x8] sm:$0xff] }
 0x246   :  { %v276_v16 = vadd.f32 %v267_v57, %v920_v14  ;;  %v36_v14 = vld [vmem:[%s975_s3] sm:$0xff]  ;;  %v41_v29 = vsub.f32 %v890_v4, %v37_v13  ;;  %v46_v4 = vmul.f32 %v42_v35, %v42_v35  ;;  %s836_s3 = smov [#allocation5]  }
 0x247   :  { %v719_v49 = vpop.f32.mrb[4].mxu1  ;;  %v708_v50 = vpop.f32.mrb[6].mxu0  ;;  %v40_v30 = vsub.f32 %v883_v2, %v36_v14  ;;  %v47_v2 = vmul.f32 %v43_v38, %v43_v38  ;;  %s616_s24 = sshll.u32 %s836_s3, 4  ;;  %s617_s24 = int_to_ptr.vmem [resolvable:$true] %s616_s24 }
 0x248   :  { %536 = vrot.lane.b32.xlu0 %v719_v49, %s834_s14  ;;  %v511_v51 = vpop.f32.mrb[5].mxu1  ;;  %v387_v52 = vpop.f32.mrb[7].mxu0  ;;  %v45_v31 = vmul.f32 %v41_v29, %v41_v29  ;;  %v50_v44 = vmul.f32 %v46_v4, %v42_v35  ;;  %s803_s26 = scalar_lea.vmem %s617_s24, 16  ;;  %s807_s27 = scalar_lea.vmem %s617_s24, 32 }
 0x249   :  { %534 = vrot.lane.b32.xlu1 %v511_v51, %s834_s14  ;;  %v44_v32 = vmul.f32 %v40_v30, %v40_v30  ;;  %v51_v47 = vmul.f32 %v47_v2, %v43_v38  ;;  %p804_p8 = scmp.ne.s32.totalorder %s617_s24, %s803_s26  ;;  %p808_p9 = scmp.lt.s32.totalorder %s617_s24, %s617_s24 }
 0x24a   :  { %v49_v36 = vmul.f32 %v45_v31, %v41_v29  ;;  %v54_v5 = vand.u32 2147483647, %v50_v44  ;;  %p809_p10 = scmp.lt.s32.totalorder %s807_s27, %s803_s26 }
 0x24b   :  { %v722_v53 = vpop.f32.mrb[6].mxu1  ;;  %v48_v37 = vmul.f32 %v44_v32, %v40_v30  ;;  %v55_v49 = vand.u32 2147483647, %v51_v47 }
 0x24c   :  { %404 = vrot.lane.b32.xlu0 %v387_v52, %s834_s14  ;;  %v521_v54 = vpop.f32.mrb[7].mxu1  ;;  %v53_v39 = vand.u32 2147483647, %v49_v36  ;;  %p810_p11 = por %p809_p10, %p808_p9 }
 0x24d   :  { %406 = vrot.lane.b32.xlu1 %v708_v50, %s834_s14  ;;  %v52_v40 = vand.u32 2147483647, %v48_v37 }
 0x24e   :  { %p811_p12 = pnand %p810_p11, %p804_p8 }
 0x250   :  { %538 = vrot.lane.b32.xlu0 %v521_v54, %s834_s14 }
 0x251   :  { %540 = vrot.lane.b32.xlu1 %v722_v53, %s834_s14 }
 0x2b6   :  { %v403_v59 = vpop.permute.xlu0 %402 }
 0x2b7   :  { %v401_v61 = vpop.permute.xlu1 %400  ;;  %v413_v63 = vadd.f32 %v403_v59, %v275_v60 }
 0x2b8   :  { %v412_v0 = vadd.f32 %v401_v61, %v274_v62 }
 0x2ba   :  { %v537_v1 = vpop.permute.xlu0 %536 }
 0x2bb   :  { %v547_v3 = vadd.f32 %v537_v1, %v413_v63  ;;  %v535_v7 = vpop.permute.xlu1 %534 }
 0x2bc   :  { %v546_v10 = vadd.f32 %v535_v7, %v412_v0 }
 0x2bd   :  { %v551_v11 = vand.u32 2147483647, %v547_v3 }
 0x2be   :  { %v550_v12 = vand.u32 2147483647, %v546_v10  ;;  %v405_v15 = vpop.permute.xlu0 %404 }
 0x2bf   :  { %v555_v17 = vmul.f32 0.003921569, %v551_v11  ;;  %v407_v18 = vpop.permute.xlu1 %406  ;;  %v414_v8 = vadd.f32 %v405_v15, %v276_v16 }
 0x2c0   :  { %v554_v20 = vmul.f32 0.003921569, %v550_v12  ;;  %v415_v9 = vadd.f32 %v407_v18, %v277_v19 }
 0x2c1   :  { %564 = vrot.lane.b32.xlu1 %v555_v17, %s835_s15 }
 0x2c2   :  { %562 = vrot.lane.b32.xlu0 %v554_v20, %s835_s15  ;;  %v539_v21 = vpop.permute.xlu0 %538 }
 0x2c3   :  { %v548_v22 = vadd.f32 %v539_v21, %v414_v8  ;;  %v541_v23 = vpop.permute.xlu1 %540 }
 0x2c4   :  { %v549_v24 = vadd.f32 %v541_v23, %v415_v9 }
 0x2c5   :  { %v552_v25 = vand.u32 2147483647, %v548_v22 }
 0x2c6   :  { %v553_v26 = vand.u32 2147483647, %v549_v24 }
 0x2c7   :  { %v556_v27 = vmul.f32 0.003921569, %v552_v25 }
 0x2c8   :  { %v557_v28 = vmul.f32 0.003921569, %v553_v26 }
 0x2c9   :  { %566 = vrot.lane.b32.xlu0 %v556_v27, %s835_s15 }
 0x2ca   :  { %568 = vrot.lane.b32.xlu1 %v557_v28, %s835_s15 }
 0x333   :  { %v565_v41 = vpop.permute.xlu1 %564 }
 0x334   :  { %v575_v42 = vmul.f32 %v565_v41, %v53_v39  ;;  %v563_v43 = vpop.permute.xlu0 %562 }
 0x335   :  { %v574_v45 = vmul.f32 %v563_v43, %v52_v40 }
 0x336   :  { %v581_v46 = vsel %vm58_vm0, %v575_v42, 0.0 }
 0x337   :  { %582 = vadd.xlane.f32.xlu1 %v581_v46  ;;  %v578_v48 = vsel %vm58_vm0, %v574_v45, 0.0 }
 0x338   :  { %579 = vadd.xlane.f32.xlu0 %v578_v48 }
 0x33b   :  { %v567_v50 = vpop.permute.xlu0 %566 }
 0x33c   :  { %v576_v6 = vmul.f32 %v567_v50, %v54_v5  ;;  %v569_v51 = vpop.permute.xlu1 %568 }
 0x33d   :  { %v577_v52 = vmul.f32 %v569_v51, %v55_v49 }
 0x33e   :  { %v584_v53 = vsel %vm58_vm0, %v576_v6, 0.0 }
 0x33f   :  { %585 = vadd.xlane.f32.xlu0 %v584_v53  ;;  %v587_v54 = vsel %vm58_vm0, %v577_v52, 0.0 }
 0x343   :  { %588 = vadd.xlane.f32.xlu0 %v587_v54 }
 0x3c4   :  { %v583_v55 = vpop.xlane.xlu1 %582 }
 0x3c5   :  { %v580_v56 = vpop.xlane.xlu0 %579  ;;  %v592_v57 = vsel %vm590_vm2, %v583_v55, 0.0 }
 0x3c6   :  { %v591_v58 = vsel %vm590_vm2, %v580_v56, 0.0 }
 0x3c7   :  { %v593_v61 = vadd.f32 %v592_v57, %v591_v58 }
 0x3cc   :  { %v586_v59 = vpop.xlane.xlu0 %585 }
 0x3cd   :  { %v594_v60 = vsel %vm590_vm2, %v586_v59, 0.0 }
 0x3ce   :  { %v595_v62 = vadd.f32 %v594_v60, %v593_v61 }
 0x3d0   :  { %v589_v63 = vpop.xlane.xlu0 %588 }
 0x3d1   :  { %v596_v0 = vsel %vm590_vm2, %v589_v63, 0.0 }
 0x3d2   :  { %v597_v1 = vadd.f32 %v596_v0, %v595_v62 }
 0x3d4   :  { %598 = vadd.xlane.f32.xlu1 %v597_v1 }
 0x461   :  { %v599_v3 = vpop.xlane.xlu1 %598 }
 0x462   :  { %v600_v7 = vrot.slane %v599_v3, 4 }
 0x464   :  { %v601_v10 = vadd.f32 %v600_v7, %v599_v3 }
 0x466   :  { %v602_v11 = vrot.slane %v601_v10, 2 }
 0x468   :  { %v603_v12 = vadd.f32 %v602_v11, %v601_v10 }
 0x46a   :  { %v604_v15 = vrot.slane %v603_v12, 1 }
 0x46c   :  { %v605_v16 = vadd.f32 %v604_v15, %v603_v12 }
 0x46e   :  { %751 = vpush %v605_v16 }
 0x49f   :  { %s752_s25 = spop %751 }
 0x4a0   :  { %v607_v17 = vstv %s752_s25 }
 0x4a1   :  { %609 = vst.msk [vmem:[#allocation5] sm:$0x1] %vm608_vm3, %v607_v17 }
 0x4a2   :  { %814 = shalt.err (!%p811_p12)
}
 0x4a3   :  { %s815_s30 = scalar_lea.hbm %s976_s4, 16 }
 0x4a4   :  { %p816_p13 = scmp.ne.s32.totalorder %s976_s4, %s815_s30  ;;  %p819_p0 = scmp.lt.u32.totalorder %s815_s30, %s976_s4 }
 0x4a6   :  { %p821_p1 = pnand %p819_p0, %p816_p13 }
 0x4a8   :  { %824 = shalt.err (!%p821_p1)
}
 0x4a9   :  { %619 = dma.vmem_to_hbm [thread:$0]  %s617_s24, 16, %s976_s4, [#allocation4]  }
 0x4aa   :  { %827 = dma.done.wait [#allocation4], 16  }
 0x4ab   :  { %828 = vsyncadd [#allocation4], 4294967280 }
 0x4ac   :  { %623 = vsyncpa [#allocation3], 1 }
 0x4ad   :  { %624 = vsyncpa [#allocation4], 1 }

</bundles_post_ra>
